<compile_context>
chip_gen: v5e
topology: v5e:2x2
jax: 0.10.0
libtpu: 0.0.40
codegen_flags: <defaults>
</compile_context>

<pallas_src>
import functools

import jax
import jax.numpy as jnp
from jax.experimental import pallas as pl
from jax.experimental.pallas import tpu as pltpu


def _class_dist_kernel(p1_ref, p2_ref, out_ref, *, bs, row_tile):
    """p1_ref/p2_ref: (row_tile, num_classes) in the input dtype.

    out_ref: (1, 1, 1) f32 partial sum for this grid block.
    """
    i = pl.program_id(0)

    # Load + cast unmasked (cast to f32 in-kernel so HBM traffic stays in the
    # native dtype). Garbage rows in the ragged tail block are zeroed by the
    # single per-row mask below; NaNs in the unselected jnp.where branch are
    # harmless.
    x1 = p1_ref[...].astype(jnp.float32)
    x2 = p2_ref[...].astype(jnp.float32)

    def _softmax(x):
        m = jnp.max(x, axis=-1, keepdims=True)
        e = jnp.exp(x - m)
        s = jnp.sum(e, axis=-1, keepdims=True)
        # EUP approx reciprocal (otherwise-idle slot) + one Newton refinement
        # to keep fp32-level accuracy on the normalizer.
        r = pl.reciprocal(s, approx=True)
        r = r * (2.0 - s * r)
        return e * r

    d = _softmax(x1) - _softmax(x2)
    per_row = jnp.sum(d * d, axis=-1, keepdims=True)          # (row_tile, 1)

    # Mask rows past the real batch size (ragged last block, no HBM padding).
    row_ids = i * row_tile + jax.lax.broadcasted_iota(jnp.int32, (row_tile, 1), 0)
    per_row = jnp.where(row_ids < bs, per_row, 0.0)

    out_ref[...] = jnp.sum(per_row).reshape(1, 1, 1)


def _vmem_limit_bytes():
    """Per-generation VMEM limit: ~75% of physical, capped at 96 MiB.
    v7x (64 MiB physical) -> 48 MiB; v5e/v6e (128 MiB) -> 96 MiB."""
    cap = 64 * 1024 * 1024  # v7x floor (smallest physical VMEM per TensorCore)
    try:
        info = pltpu.get_tpu_info()
        cap = int(getattr(info, "vmem_capacity_bytes", cap)) or cap
    except Exception:
        pass
    return min((cap * 3) // 4, 96 * 1024 * 1024)


def _pick_row_tile(bs, num_classes, itemsize, vmem_limit_bytes,
                   target_block_bytes=4 * 1024 * 1024):
    """Row tile sized by bytes, fitting the real per-step VMEM working set."""
    # Sublane packing for the input dtype: 8 for f32, 16 for bf16, 32 for int8.
    pack = max(8, 32 // itemsize)
    padded_rows = -(-bs // pack) * pack

    # VMEM bytes needed per row of tile:
    #   2 inputs x 2 pipeline buffers in the native dtype
    # + ~4 full-tile f32 temporaries for the in-kernel softmax (x1/x2/exp/diff).
    per_row_vmem = 2 * 2 * num_classes * itemsize + 4 * num_classes * 4
    budget = (vmem_limit_bytes * 3) // 4          # headroom for misc scratch
    tile_vmem = budget // max(1, per_row_vmem)

    # Aim for a few-MiB input block (amortizes per-grid-step overhead and DMA
    # descriptors) rather than a fixed row count.
    tile_tgt = target_block_bytes // max(1, num_classes * itemsize)

    tile = max(pack, min(tile_vmem, tile_tgt))
    tile = (tile // pack) * pack

    # Keep >= 2 grid blocks whenever the batch allows it so v7x's second
    # TensorCore gets work on the "parallel" axis (no effect on 1-TC chips).
    if padded_rows >= 2 * pack:
        half = -(-(padded_rows // 2) // pack) * pack
        tile = min(tile, half)

    return min(tile, padded_rows)


def class_dist_loss(pred1, pred2):
    """JAX/Pallas equivalent of ClassDistLoss.forward. Returns (loss, bs)."""
    assert pred1.shape == pred2.shape
    bs, num_classes = pred1.shape

    itemsize = jnp.dtype(pred1.dtype).itemsize
    vmem_limit = _vmem_limit_bytes()
    row_tile = _pick_row_tile(bs, num_classes, itemsize, vmem_limit)
    num_blocks = pl.cdiv(bs, row_tile)

    kernel = functools.partial(_class_dist_kernel, bs=bs, row_tile=row_tile)

    partials = pl.pallas_call(
        kernel,
        out_shape=jax.ShapeDtypeStruct((num_blocks, 1, 1), jnp.float32),
        grid_spec=pltpu.PrefetchScalarGridSpec(
            num_scalar_prefetch=0,
            grid=(num_blocks,),
            in_specs=[
                pl.BlockSpec((row_tile, num_classes), lambda i: (i, 0)),
                pl.BlockSpec((row_tile, num_classes), lambda i: (i, 0)),
            ],
            out_specs=pl.BlockSpec((1, 1, 1), lambda i: (i, 0, 0)),
        ),
        compiler_params=pltpu.CompilerParams(
            dimension_semantics=("parallel",),   # independent row blocks
            vmem_limit_bytes=vmem_limit,
        ),
    )(pred1, pred2)

    loss = jnp.sum(partials) / jnp.float32(num_classes)
    return loss, bs


if __name__ == "__main__":
    # Small shapes consistent with the module: (bs, num_classes) logits.
    bs, num_classes = 2, 32
    key = jax.random.PRNGKey(0)
    k1, k2 = jax.random.split(key)
    pred1 = jax.random.normal(k1, (bs, num_classes), dtype=jnp.float32)
    pred2 = jax.random.normal(k2, (bs, num_classes), dtype=jnp.float32)

    loss, out_bs = class_dist_loss(pred1, pred2)
    loss = jax.block_until_ready(loss)

    # Pure-JAX reference (same math as the PyTorch forward).
    s1 = jax.nn.softmax(pred1, axis=1)
    s2 = jax.nn.softmax(pred2, axis=1)
    ref = jnp.sum((s1 - s2) ** 2) / num_classes

    assert jnp.allclose(loss, ref, rtol=1e-5, atol=1e-6), (loss, ref)
    assert out_bs == bs

    print("KERNEL_OK")
</pallas_src>

<mosaic_0001>
module attributes {stable_mosaic.version = 11 : i64} {
  func.func @_class_dist_kernel(%arg0: i32, %arg1: memref<8x32xf32, #tpu.memory_space<vmem>>, %arg2: memref<8x32xf32, #tpu.memory_space<vmem>>, %arg3: memref<1x1x1xf32, #tpu.memory_space<vmem>>) attributes {dimension_semantics = [#tpu.dimension_semantics<parallel>], iteration_bounds = array<i64: 1>, scalar_prefetch = 0 : i64, scratch_operands = 0 : i64, tpu.core_type = #tpu.core_type<tc>, window_params = [{transform_indices = @transform_0, window_bounds = array<i64: 8, 32>}, {transform_indices = @transform_1, window_bounds = array<i64: 8, 32>}, {transform_indices = @transform_2, window_bounds = array<i64: 1, 1, 1>}]} {
    %c0 = arith.constant 0 : index
    %c0_0 = arith.constant 0 : index
    %0 = vector.load %arg1[%c0, %c0_0] : memref<8x32xf32, #tpu.memory_space<vmem>>, vector<8x32xf32>
    %c0_1 = arith.constant 0 : index
    %c0_2 = arith.constant 0 : index
    %1 = vector.load %arg2[%c0_1, %c0_2] : memref<8x32xf32, #tpu.memory_space<vmem>>, vector<8x32xf32>
    %cst = arith.constant dense<0xFF800000> : vector<8xf32>
    %2 = vector.multi_reduction <maximumf>, %0, %cst [1] : vector<8x32xf32> to vector<8xf32>
    %3 = vector.shape_cast %2 : vector<8xf32> to vector<8x1xf32>
    %4 = vector.broadcast %3 : vector<8x1xf32> to vector<8x32xf32>
    %5 = arith.subf %0, %4 : vector<8x32xf32>
    %6 = math.exp %5 : vector<8x32xf32>
    %cst_3 = arith.constant dense<0.000000e+00> : vector<8xf32>
    %7 = vector.multi_reduction <add>, %6, %cst_3 [1] : vector<8x32xf32> to vector<8xf32>
    %8 = vector.shape_cast %7 : vector<8xf32> to vector<8x1xf32>
    %9 = tpu.reciprocal %8 {approx = true} : vector<8x1xf32> -> vector<8x1xf32>
    %10 = arith.mulf %8, %9 : vector<8x1xf32>
    %cst_4 = arith.constant 2.000000e+00 : f32
    %11 = vector.broadcast %cst_4 : f32 to vector<8x1xf32>
    %12 = arith.subf %11, %10 : vector<8x1xf32>
    %13 = arith.mulf %9, %12 : vector<8x1xf32>
    %14 = vector.broadcast %13 : vector<8x1xf32> to vector<8x32xf32>
    %15 = arith.mulf %6, %14 : vector<8x32xf32>
    %cst_5 = arith.constant dense<0xFF800000> : vector<8xf32>
    %16 = vector.multi_reduction <maximumf>, %1, %cst_5 [1] : vector<8x32xf32> to vector<8xf32>
    %17 = vector.shape_cast %16 : vector<8xf32> to vector<8x1xf32>
    %18 = vector.broadcast %17 : vector<8x1xf32> to vector<8x32xf32>
    %19 = arith.subf %1, %18 : vector<8x32xf32>
    %20 = math.exp %19 : vector<8x32xf32>
    %cst_6 = arith.constant dense<0.000000e+00> : vector<8xf32>
    %21 = vector.multi_reduction <add>, %20, %cst_6 [1] : vector<8x32xf32> to vector<8xf32>
    %22 = vector.shape_cast %21 : vector<8xf32> to vector<8x1xf32>
    %23 = tpu.reciprocal %22 {approx = true} : vector<8x1xf32> -> vector<8x1xf32>
    %24 = arith.mulf %22, %23 : vector<8x1xf32>
    %cst_7 = arith.constant 2.000000e+00 : f32
    %25 = vector.broadcast %cst_7 : f32 to vector<8x1xf32>
    %26 = arith.subf %25, %24 : vector<8x1xf32>
    %27 = arith.mulf %23, %26 : vector<8x1xf32>
    %28 = vector.broadcast %27 : vector<8x1xf32> to vector<8x32xf32>
    %29 = arith.mulf %20, %28 : vector<8x32xf32>
    %30 = arith.subf %15, %29 : vector<8x32xf32>
    %31 = arith.mulf %30, %30 : vector<8x32xf32>
    %cst_8 = arith.constant dense<0.000000e+00> : vector<8xf32>
    %32 = vector.multi_reduction <add>, %31, %cst_8 [1] : vector<8x32xf32> to vector<8xf32>
    %33 = vector.shape_cast %32 : vector<8xf32> to vector<8x1xf32>
    %c8_i32 = arith.constant 8 : i32
    %34 = arith.muli %arg0, %c8_i32 : i32
    %35 = tpu.iota {dimensions = array<i32: 0>} : vector<8x1xi32>
    %36 = vector.broadcast %34 : i32 to vector<8x1xi32>
    %37 = arith.addi %36, %35 : vector<8x1xi32>
    %c2_i32 = arith.constant 2 : i32
    %38 = vector.broadcast %c2_i32 : i32 to vector<8x1xi32>
    %39 = arith.cmpi slt, %37, %38 : vector<8x1xi32>
    %cst_9 = arith.constant 0.000000e+00 : f32
    %40 = vector.broadcast %cst_9 : f32 to vector<8x1xf32>
    %41 = arith.select %39, %33, %40 : vector<8x1xi1>, vector<8x1xf32>
    %42 = vector.shape_cast %41 : vector<8x1xf32> to vector<1x8x1xf32>
    %cst_10 = arith.constant dense<0.000000e+00> : vector<1xf32>
    %43 = vector.multi_reduction <add>, %42, %cst_10 [1, 2] : vector<1x8x1xf32> to vector<1xf32>
    %44 = vector.shape_cast %43 : vector<1xf32> to vector<1x1x1xf32>
    %45 = vector.extract %44[0, 0, 0] : f32 from vector<1x1x1xf32>
    %46 = vector.broadcast %45 : f32 to vector<1x1x1xf32>
    %c0_11 = arith.constant 0 : index
    %c0_12 = arith.constant 0 : index
    %c0_13 = arith.constant 0 : index
    %47 = vector.load %arg3[%c0_11, %c0_12, %c0_13] : memref<1x1x1xf32, #tpu.memory_space<vmem>>, vector<1x1x1xf32>
    tpu.vector_store %arg3[%c0_11, %c0_12, %c0_13], %46 {strides = array<i32>} : memref<1x1x1xf32, #tpu.memory_space<vmem>>, vector<1x1x1xf32>,
    return
  }
  func.func @transform_0(%arg0: i32) -> (i32, i32) {
    %c0_i32 = arith.constant 0 : i32
    %c0_i32_0 = arith.constant 0 : i32
    return %arg0, %c0_i32 : i32, i32
  }
  func.func @transform_1(%arg0: i32) -> (i32, i32) {
    %c0_i32 = arith.constant 0 : i32
    %c0_i32_0 = arith.constant 0 : i32
    return %arg0, %c0_i32 : i32, i32
  }
  func.func @transform_2(%arg0: i32) -> (i32, i32, i32) {
    %c0_i32 = arith.constant 0 : i32
    %c0_i32_0 = arith.constant 0 : i32
    %c0_i32_1 = arith.constant 0 : i32
    return %arg0, %c0_i32, %c0_i32_0 : i32, i32, i32
  }
}

</mosaic_0001>

<bundles_post_ra>
// kernel: tpu_custom_call.1
= control target key start
LH: loop header
LB: loop body
LE: loop exit
PB: predicated region body
PF: predicated region fallthrough
CT: control target
= control target key end

     0   :  { %7 = vsyncpa [#allocation3], 0  ;;  %s246_s0 = inlined_call_operand.hbm [shape: f32[2,32], index: 0, kind: input, shape index: {}]   ;;  %s247_s1 = inlined_call_operand.hbm [shape: f32[2,32], index: 1, kind: input, shape index: {}]   ;;  %s248_s2 = inlined_call_operand.hbm [shape: f32[1,1,1], index: 2, kind: output, shape index: {}]  }
   0x1   :  { %8 = vsyncpa [#allocation6], 0 }
   0x2   :  { %9 = vsyncpa [#allocation4], 0 }
   0x3   :  { %13 = vsyncadd [#allocation3], 96  ;;  %s14_s11 = sshll.u32 %s246_s0, 4  ;;  %s212_s12 = smov [#allocation2]   ;;  %s15_s11 = int_to_ptr.hbm [resolvable:$true] %s14_s11 }
   0x4   :  { %s16_s13 = sshll.u32 %s212_s12, 4  ;;  %s213_s14 = smov 32   ;;  %s17_s13 = int_to_ptr.vmem [resolvable:$true] %s16_s13 }
   0x5   :  { %s214_s15 = smov 2  }
   0x6   :  { %22 = dma.hbm_to_vmem [thread:$0]  %s15_s11, 32, %s17_s13, [#allocation3], %s213_s14, %s213_s14, %s214_s15  }
   0x7   :  { %26 = vsyncadd [#allocation6], 96  ;;  %s27_s18 = sshll.u32 %s247_s1, 4  ;;  %s215_s19 = smov [#allocation5]   ;;  %s28_s18 = int_to_ptr.hbm [resolvable:$true] %s27_s18 }
   0x8   :  { %s29_s20 = sshll.u32 %s215_s19, 4  ;;  %s30_s20 = int_to_ptr.vmem [resolvable:$true] %s29_s20 }
   0x9   :  { %35 = dma.hbm_to_vmem [thread:$0]  %s28_s18, 32, %s30_s20, [#allocation6], %s213_s14, %s213_s14, %s214_s15  }
   0xa   :  { %206 = dma.done.wait [#allocation3], 128  }
   0xb   :  { %207 = vsyncadd [#allocation3], 4294967168 }
   0xc   :  { %208 = dma.done.wait [#allocation6], 128  }
   0xd   :  { %209 = vsyncadd [#allocation6], 4294967168  ;;  %vm46_vm0 = vcmask 261120   ;;  %v44_v0 = vld [vmem:[#allocation2] sm:$0xff]  ;;  %v45_v2 = vld [vmem:[#allocation5] sm:$0xff]  ;;  %v81_v29 = vlaneseq  ;;  %vm87_vm2 = vcmask 7168  }
   0xe   :  { %v47_v1 = vsel %vm46_vm0, %v44_v0, -inf  ;;  %v61_v3 = vsel %vm46_vm0, %v45_v2, -inf  ;;  %s216_s0 = smov [#allocation7]   ;;  %s108_s23 = sshll.u32 %s248_s2, 4  ;;  %vm99_vm3 = vcmask 0   ;;  %s109_s23 = int_to_ptr.hbm [resolvable:$true] %s108_s23 }
   0xf   :  { %48 = vmax.xlane.f32.xlu0 %v47_v1  ;;  %v82_v30 = vshrl.u32 %v81_v29, 7  ;;  %s106_s1 = sshll.u32 %s216_s0, 4  ;;  %s107_s1 = int_to_ptr.vmem [resolvable:$true] %s106_s1 }
  0x11   :  { %vm85_vm1 = vcmp.lt.s32.totalorder %v82_v30, 2 }
  0x17   :  { %62 = vmax.xlane.f32.xlu0 %v61_v3 }
  0x82   :  { %v49_v4 = vpop.xlane.xlu0 %48 }
  0x83   :  { %v50_v5 = vsub.f32 %v44_v0, %v49_v4 }
  0x85   :  { %v51_v6 = vmul.f32 1.442695, %v50_v5 }
  0x87   :  { %126 = vpow2.f32 %v51_v6 }
  0x8a   :  { %v63_v7 = vpop.xlane.xlu0 %62 }
  0x8b   :  { %v64_v8 = vsub.f32 %v45_v2, %v63_v7 }
  0x8d   :  { %v127_v9 = vpop.eup %126  ;;  %v65_v10 = vmul.f32 1.442695, %v64_v8 }
  0x8e   :  { %v53_v11 = vsel %vm46_vm0, %v127_v9, 0.0 }
  0x8f   :  { %128 = vpow2.f32 %v65_v10  ;;  %54 = vadd.xlane.f32.xlu1 %v53_v11 }
  0x95   :  { %v129_v12 = vpop.eup %128 }
  0x96   :  { %v67_v13 = vsel %vm46_vm0, %v129_v12, 0.0 }
  0x97   :  { %68 = vadd.xlane.f32.xlu1 %v67_v13 }
 0x102   :  { %v55_v14 = vpop.xlane.xlu1 %54 }
 0x103   :  { %130 = vrcp.f32 %v55_v14 }
 0x109   :  { %v131_v15 = vpop.eup %130 }
 0x10a   :  { %v69_v16 = vpop.xlane.xlu1 %68  ;;  %v57_v17 = vmul.f32 %v131_v15, %v55_v14 }
 0x10b   :  { %132 = vrcp.f32 %v69_v16 }
 0x10c   :  { %v58_v18 = vsub.f32 2.0, %v57_v17 }
 0x10e   :  { %v59_v21 = vmul.f32 %v131_v15, %v58_v18 }
 0x110   :  { %v60_v24 = vmul.f32 %v127_v9, %v59_v21 }
 0x111   :  { %v133_v19 = vpop.eup %132 }
 0x112   :  { %v71_v20 = vmul.f32 %v133_v19, %v69_v16 }
 0x114   :  { %v72_v22 = vsub.f32 2.0, %v71_v20 }
 0x116   :  { %v73_v23 = vmul.f32 %v133_v19, %v72_v22 }
 0x118   :  { %v74_v25 = vmul.f32 %v129_v12, %v73_v23 }
 0x11a   :  { %v75_v26 = vsub.f32 %v60_v24, %v74_v25 }
 0x11c   :  { %v76_v27 = vmul.f32 %v75_v26, %v75_v26 }
 0x11e   :  { %v77_v28 = vsel %vm46_vm0, %v76_v27, 0.0 }
 0x11f   :  { %78 = vadd.xlane.f32.xlu2 %v77_v28 }
 0x192   :  { %v79_v31 = vpop.xlane.xlu2 %78 }
 0x193   :  { %v86_v32 = vsel %vm85_vm1, %v79_v31, 0.0 }
 0x194   :  { %v88_v33 = vsel %vm87_vm2, %v86_v32, 0.0 }
 0x195   :  { %89 = vadd.xlane.f32.xlu2 %v88_v33 }
 0x208   :  { %v90_v34 = vpop.xlane.xlu2 %89 }
 0x209   :  { %v91_v35 = vrot.slane %v90_v34, 4 }
 0x20b   :  { %v92_v36 = vadd.f32 %v91_v35, %v90_v34 }
 0x20d   :  { %v93_v37 = vrot.slane %v92_v36, 2 }
 0x20f   :  { %v94_v38 = vadd.f32 %v93_v37, %v92_v36 }
 0x211   :  { %v95_v39 = vrot.slane %v94_v38, 1 }
 0x213   :  { %v96_v40 = vadd.f32 %v95_v39, %v94_v38 }
 0x215   :  { %119 = vpush %v96_v40 }
 0x246   :  { %s120_s24 = spop %119 }
 0x247   :  { %v98_v41 = vstv %s120_s24 }
 0x248   :  { %100 = vst.msk [vmem:[#allocation7] sm:$0x1] %vm99_vm3, %v98_v41 }
 0x249   :  { %111 = dma.vmem_to_hbm [thread:$0]  %s107_s1, 16, %s109_s23, [#allocation4]  }
 0x24a   :  { %210 = dma.done.wait [#allocation4], 16  }
 0x24b   :  { %211 = vsyncadd [#allocation4], 4294967280 }
 0x24c   :  { %116 = vsyncpa [#allocation3], 1 }
 0x24d   :  { %117 = vsyncpa [#allocation6], 1 }
 0x24e   :  { %118 = vsyncpa [#allocation4], 1 }

</bundles_post_ra>
